<compile_context>
chip_gen: v6e
topology: v6e:2x2x1
jax: 0.10.0
libtpu: 0.0.40
codegen_flags: <defaults>
</compile_context>

<pallas_src>
import functools

import jax
import jax.numpy as jnp
from jax import lax
from jax.experimental import pallas as pl
from jax.experimental.pallas import tpu as pltpu


_VMEM_LIMIT_BYTES = 48 * 1024 * 1024   # fits v7x (64 MiB phys); generous on v5e/v6e


@functools.lru_cache(maxsize=None)
def _pipeline_mode_supported():
    """Probe once whether BlockSpec(pipeline_mode=pl.Buffered(k)) lowers here."""
    if not hasattr(pl, "Buffered"):
        return False

    def _copy(x_ref, o_ref):
        o_ref[...] = x_ref[...]

    try:
        spec = pl.BlockSpec((8, 128), lambda i: (0, 0), pipeline_mode=pl.Buffered(1))
        fn = pl.pallas_call(
            _copy,
            out_shape=jax.ShapeDtypeStruct((8, 128), jnp.float32),
            grid=(1,),
            in_specs=[spec],
            out_specs=pl.BlockSpec((8, 128), lambda i: (0, 0)),
        )
        jax.block_until_ready(fn(jnp.zeros((8, 128), jnp.float32)))
        return True
    except Exception:   # fall back to default double-buffering
        return False


def _const_spec(shape, index_map):
    """BlockSpec for grid-invariant operands; single-buffered when supported."""
    if _pipeline_mode_supported():
        return pl.BlockSpec(shape, index_map, pipeline_mode=pl.Buffered(1))
    return pl.BlockSpec(shape, index_map)


# ---------------------------------------------------------------------------
# Kernels
# ---------------------------------------------------------------------------

def _kv_proj_kernel(x_ref, wk_ref, wv_ref, bk_ref, bv_ref, k_ref, v_ref):
    """Project K and V for one token tile (bf16 matmul operands, f32 accumulate)."""
    xb = x_ref[0].astype(jnp.bfloat16)                                    # (t, C)
    k = jnp.dot(xb, wk_ref[...], preferred_element_type=jnp.float32) + bk_ref[...]
    v = jnp.dot(xb, wv_ref[...], preferred_element_type=jnp.float32) + bv_ref[...]
    k_ref[0] = k.astype(jnp.bfloat16)
    v_ref[0] = v.astype(jnp.bfloat16)


def _flash_attn_kernel(x_q_ref, k_ref, v_ref, wq_ref, wout_ref, bq_ref, bout_ref,
                       o_ref, q_scr, m_scr, l_scr, acc_scr, *, hw, hwp, tkv):
    """Grid = (batch, q_tiles, kv_tiles); kv axis is the (innermost) reduction."""
    ki = pl.program_id(2)

    # --- init: project Q once per (batch, q-tile); reset online-softmax state ---
    @pl.when(ki == 0)
    def _init():
        xq = x_q_ref[0].astype(jnp.bfloat16)                              # (tq, C)
        q = jnp.dot(xq, wq_ref[...],                                      # scale folded into wq/bq
                    preferred_element_type=jnp.float32) + bq_ref[...]
        q_scr[...] = q.astype(jnp.bfloat16)
        m_scr[...] = jnp.full_like(m_scr, -jnp.inf)
        l_scr[...] = jnp.zeros_like(l_scr)
        acc_scr[...] = jnp.zeros_like(acc_scr)

    # --- scores for this kv tile: NT contraction, K never transposed ---
    s = lax.dot_general(q_scr[...], k_ref[0], (((1,), (1,)), ((), ())),
                        preferred_element_type=jnp.float32)               # (tq, tkv) f32
    if hwp != hw:   # static: only emitted when the token axis was padded
        kv_idx = ki * tkv + lax.broadcasted_iota(jnp.int32, s.shape, 1)
        s = jnp.where(kv_idx < hw, s, -jnp.inf)

    # --- online softmax update (statistics in f32) ---
    m_prev = m_scr[...]
    m_new = jnp.maximum(m_prev, jnp.max(s, axis=-1, keepdims=True))
    alpha = jnp.exp(m_prev - m_new)
    p = jnp.exp(s - m_new)
    l_scr[...] = alpha * l_scr[...] + jnp.sum(p, axis=-1, keepdims=True)
    acc_scr[...] = alpha * acc_scr[...] + jnp.dot(
        p.astype(jnp.bfloat16), v_ref[0], preferred_element_type=jnp.float32)
    m_scr[...] = m_new

    # --- finalize: normalize after PV, output projection, residual (f32) ---
    @pl.when(ki == pl.num_programs(2) - 1)
    def _finalize():
        inv_l = pl.reciprocal(l_scr[...], approx=True)                    # EUP slot, ~free
        attn_out = (acc_scr[...] * inv_l).astype(jnp.bfloat16)            # (tq, C)
        out = jnp.dot(attn_out, wout_ref[...],
                      preferred_element_type=jnp.float32) + bout_ref[...]
        o_ref[0] = (x_q_ref[0].astype(jnp.float32) + out).astype(o_ref.dtype)


# ---------------------------------------------------------------------------
# Wrapper
# ---------------------------------------------------------------------------

def _pick_tile_128(n_blocks, target):
    """Largest multiple of 128 dividing n_blocks*128 that is <= target (>= 128)."""
    limit = max(1, target // 128)
    best = 1
    for d in range(1, n_blocks + 1):
        if n_blocks % d == 0 and d <= limit:
            best = d
    return best * 128


def attention_block(x_nchw, wqkv, bqkv, wout, bout, *,
                    tq_target=256, tkv_target=512):
    """AttentionBlock forward. x: (B,C,H,W); wqkv: (3C,C); bqkv: (3C,); wout: (C,C); bout: (C,)."""
    b, c, h, w = x_nchw.shape
    hw = h * w

    # NCHW -> (B, HW, C) tokens-major (1x1 convs become channel matmuls).
    x_tok = jnp.transpose(x_nchw.reshape(b, c, hw), (0, 2, 1)).astype(jnp.float32)

    # Pad the token axis to a multiple of 128 so all tiles are lane/MXU aligned;
    # padded KV positions are masked to -inf inside the kernel.
    hwp = ((hw + 127) // 128) * 128
    if hwp != hw:
        x_tok = jnp.pad(x_tok, ((0, 0), (0, hwp - hw), (0, 0)))

    # Split + pre-transpose projection weights once in XLA; fold 1/sqrt(C) into Wq/bq.
    scale = 1.0 / (c ** 0.5)
    wq, wk, wv = wqkv[:c], wqkv[c:2 * c], wqkv[2 * c:]
    wq_t = (wq.T * scale).astype(jnp.bfloat16)        # (C_in, C_out)
    wk_t = wk.T.astype(jnp.bfloat16)
    wv_t = wv.T.astype(jnp.bfloat16)
    wout_t = wout.T.astype(jnp.bfloat16)
    bq = (bqkv[:c] * scale).reshape(1, c).astype(jnp.float32)
    bk = bqkv[c:2 * c].reshape(1, c).astype(jnp.float32)
    bv = bqkv[2 * c:].reshape(1, c).astype(jnp.float32)
    bo = bout.reshape(1, c).astype(jnp.float32)

    # --- tile selection: multiples of 128 only; collapse tiny problems ---
    n_blocks = hwp // 128
    if hwp <= 512:
        tq = tkv = hwp                      # grid (B, 1, 1): one step per batch
    else:
        tq = _pick_tile_128(n_blocks, tq_target)
        tkv = _pick_tile_128(n_blocks, tkv_target)
    # Feed both v7x TensorCores: want >= 2 "parallel" grid steps when possible.
    if b * (hwp // tq) < 2:
        divisors = [d for d in range(1, n_blocks) if n_blocks % d == 0]
        if divisors:
            tq = max(divisors) * 128

    n_q = hwp // tq
    n_kv = hwp // tkv
    tproj = _pick_tile_128(n_blocks, 512)

    # --- prologue: project K / V once per token (bf16 out, bias folded) ---
    kv_struct = jax.ShapeDtypeStruct((b, hwp, c), jnp.bfloat16)
    k_tok, v_tok = pl.pallas_call(
        _kv_proj_kernel,
        out_shape=(kv_struct, kv_struct),
        grid_spec=pltpu.PrefetchScalarGridSpec(
            num_scalar_prefetch=0,
            grid=(b, hwp // tproj),
            in_specs=[
                pl.BlockSpec((1, tproj, c), lambda bi, ti: (bi, ti, 0)),   # x
                _const_spec((c, c), lambda bi, ti: (0, 0)),                # Wk^T
                _const_spec((c, c), lambda bi, ti: (0, 0)),                # Wv^T
                _const_spec((1, c), lambda bi, ti: (0, 0)),                # bk
                _const_spec((1, c), lambda bi, ti: (0, 0)),                # bv
            ],
            out_specs=(
                pl.BlockSpec((1, tproj, c), lambda bi, ti: (bi, ti, 0)),   # K
                pl.BlockSpec((1, tproj, c), lambda bi, ti: (bi, ti, 0)),   # V
            ),
        ),
        compiler_params=pltpu.CompilerParams(
            dimension_semantics=("parallel", "parallel"),
            vmem_limit_bytes=_VMEM_LIMIT_BYTES),
    )(x_tok, wk_t, wv_t, bk, bv)

    # --- flash attention + output projection + residual ---
    kernel = functools.partial(_flash_attn_kernel, hw=hw, hwp=hwp, tkv=tkv)
    out_tok = pl.pallas_call(
        kernel,
        out_shape=jax.ShapeDtypeStruct((b, hwp, c), x_nchw.dtype),
        grid_spec=pltpu.PrefetchScalarGridSpec(
            num_scalar_prefetch=0,
            grid=(b, n_q, n_kv),
            in_specs=[
                pl.BlockSpec((1, tq, c), lambda bi, qi, ki: (bi, qi, 0)),   # x: q tile + residual (f32)
                pl.BlockSpec((1, tkv, c), lambda bi, qi, ki: (bi, ki, 0)),  # K (bf16, streamed)
                pl.BlockSpec((1, tkv, c), lambda bi, qi, ki: (bi, ki, 0)),  # V (bf16, streamed)
                _const_spec((c, c), lambda bi, qi, ki: (0, 0)),             # Wq^T (scaled)
                _const_spec((c, c), lambda bi, qi, ki: (0, 0)),             # Wout^T
                _const_spec((1, c), lambda bi, qi, ki: (0, 0)),             # bq (scaled)
                _const_spec((1, c), lambda bi, qi, ki: (0, 0)),             # bout
            ],
            out_specs=pl.BlockSpec((1, tq, c), lambda bi, qi, ki: (bi, qi, 0)),
            scratch_shapes=[
                pltpu.VMEM((tq, c), jnp.bfloat16),   # resident Q tile
                pltpu.VMEM((tq, 1), jnp.float32),    # running max
                pltpu.VMEM((tq, 1), jnp.float32),    # running denom
                pltpu.VMEM((tq, c), jnp.float32),    # output accumulator
            ],
        ),
        compiler_params=pltpu.CompilerParams(
            dimension_semantics=("parallel", "parallel", "arbitrary"),
            vmem_limit_bytes=_VMEM_LIMIT_BYTES),
    )(x_tok, k_tok, v_tok, wq_t, wout_t, bq, bo)

    if hwp != hw:
        out_tok = out_tok[:, :hw, :]
    # (B, HW, C) -> NCHW
    return jnp.transpose(out_tok, (0, 2, 1)).reshape(b, c, h, w)


# ---------------------------------------------------------------------------
# Pure-JAX f32 reference mirroring the PyTorch forward
# ---------------------------------------------------------------------------

def _reference(x_nchw, wqkv, bqkv, wout, bout):
    b, c, h, w = x_nchw.shape
    hw = h * w
    x_tok = jnp.transpose(x_nchw.reshape(b, c, hw), (0, 2, 1)).astype(jnp.float32)
    qkv = jnp.einsum("bnc,oc->bno", x_tok, wqkv.astype(jnp.float32)) + bqkv
    q, k, v = qkv[..., :c], qkv[..., c:2 * c], qkv[..., 2 * c:]
    scores = jnp.einsum("bnc,bmc->bnm", q, k) / (c ** 0.5)
    attn = jax.nn.softmax(scores, axis=-1)
    attn_out = jnp.einsum("bnm,bmc->bnc", attn, v)
    out = jnp.einsum("bnc,oc->bno", attn_out, wout.astype(jnp.float32)) + bout
    y = x_tok + out
    return jnp.transpose(y, (0, 2, 1)).reshape(b, c, h, w).astype(x_nchw.dtype)


if __name__ == "__main__":
    def _make_params(key, c):
        k1, k2, k3, k4 = jax.random.split(key, 4)
        bound = 1.0 / (c ** 0.5)
        wqkv = jax.random.uniform(k1, (3 * c, c), jnp.float32, -bound, bound)
        bqkv = jax.random.uniform(k2, (3 * c,), jnp.float32, -bound, bound)
        wout = jax.random.uniform(k3, (c, c), jnp.float32, -bound, bound)
        bout = jax.random.uniform(k4, (c,), jnp.float32, -bound, bound)
        return wqkv, bqkv, wout, bout

    key = jax.random.PRNGKey(0)

    # (1) module-consistent small shape: collapsed grid (B, 1, 1) fast path.
    # (2) larger spatial extent: exercises the hoisted K/V projection and the
    #     multi-tile online-softmax loop (grid (1, 4, 2)).
    # (3) HW not a multiple of 128: exercises token-axis padding + kv masking.
    configs = [
        dict(B=2, C=32, H=16, W=16),
        dict(B=1, C=32, H=32, W=32),
        dict(B=1, C=32, H=10, W=10),
    ]
    for cfg in configs:
        key, kx, kp = jax.random.split(key, 3)
        B, C, H, W = cfg["B"], cfg["C"], cfg["H"], cfg["W"]
        x = jax.random.normal(kx, (B, C, H, W), dtype=jnp.float32)
        wqkv, bqkv, wout, bout = _make_params(kp, C)

        y = jax.block_until_ready(attention_block(x, wqkv, bqkv, wout, bout))
        y_ref = _reference(x, wqkv, bqkv, wout, bout)

        assert y.shape == (B, C, H, W)
        # bf16 matmul operands (f32 accumulation / stats) => bf16-level tolerance.
        assert jnp.allclose(y, y_ref, atol=5e-2, rtol=5e-2), f"mismatch for {cfg}"

    print("KERNEL_OK")
</pallas_src>

<mosaic_0001>
module attributes {stable_mosaic.version = 11 : i64} {
  func.func @_copy(%arg0: i32, %arg1: memref<8x128xf32, #tpu.memory_space<vmem>>, %arg2: memref<8x128xf32, #tpu.memory_space<vmem>>) attributes {dimension_semantics = [#tpu.dimension_semantics<arbitrary>], iteration_bounds = array<i64: 1>, scalar_prefetch = 0 : i64, scratch_operands = 0 : i64, tpu.core_type = #tpu.core_type<tc>, window_params = [{pipeline_mode = #tpu.pipeline_mode<synchronous>, transform_indices = @transform_0, window_bounds = array<i64: 8, 128>}, {pipeline_mode = #tpu.pipeline_mode<synchronous>, transform_indices = @transform_1, window_bounds = array<i64: 8, 128>}]} {
    %c0 = arith.constant 0 : index
    %c0_0 = arith.constant 0 : index
    %0 = vector.load %arg1[%c0, %c0_0] : memref<8x128xf32, #tpu.memory_space<vmem>>, vector<8x128xf32>
    %c0_1 = arith.constant 0 : index
    %c0_2 = arith.constant 0 : index
    %1 = vector.load %arg2[%c0_1, %c0_2] : memref<8x128xf32, #tpu.memory_space<vmem>>, vector<8x128xf32>
    tpu.vector_store %arg2[%c0_1, %c0_2], %0 {strides = array<i32>} : memref<8x128xf32, #tpu.memory_space<vmem>>, vector<8x128xf32>,
    return
  }
  func.func @transform_0(%arg0: i32) -> (i32, i32) {
    %c0_i32 = arith.constant 0 : i32
    %c0_i32_0 = arith.constant 0 : i32
    %c0_i32_1 = arith.constant 0 : i32
    return %c0_i32, %c0_i32_0 : i32, i32
  }
  func.func @transform_1(%arg0: i32) -> (i32, i32) {
    %c0_i32 = arith.constant 0 : i32
    %c0_i32_0 = arith.constant 0 : i32
    %c0_i32_1 = arith.constant 0 : i32
    return %c0_i32, %c0_i32_0 : i32, i32
  }
}

module attributes {stable_mosaic.version = 11 : i64} {
  func.func @_kv_proj_kernel(%arg0: i32, %arg1: i32, %arg2: memref<1x256x32xf32, #tpu.memory_space<vmem>>, %arg3: memref<32x32xbf16, #tpu.memory_space<vmem>>, %arg4: memref<32x32xbf16, #tpu.memory_space<vmem>>, %arg5: memref<1x32xf32, #tpu.memory_space<vmem>>, %arg6: memref<1x32xf32, #tpu.memory_space<vmem>>, %arg7: memref<1x256x32xbf16, #tpu.memory_space<vmem>>, %arg8: memref<1x256x32xbf16, #tpu.memory_space<vmem>>) attributes {dimension_semantics = [#tpu.dimension_semantics<parallel>, #tpu.dimension_semantics<parallel>], iteration_bounds = array<i64: 2, 1>, scalar_prefetch = 0 : i64, scratch_operands = 0 : i64, tpu.core_type = #tpu.core_type<tc>, window_params = [{transform_indices = @transform_0, window_bounds = array<i64: 1, 256, 32>}, {pipeline_mode = #tpu.pipeline_mode<synchronous>, transform_indices = @transform_1, window_bounds = array<i64: 32, 32>}, {pipeline_mode = #tpu.pipeline_mode<synchronous>, transform_indices = @transform_2, window_bounds = array<i64: 32, 32>}, {pipeline_mode = #tpu.pipeline_mode<synchronous>, transform_indices = @transform_3, window_bounds = array<i64: 1, 32>}, {pipeline_mode = #tpu.pipeline_mode<synchronous>, transform_indices = @transform_4, window_bounds = array<i64: 1, 32>}, {transform_indices = @transform_5, window_bounds = array<i64: 1, 256, 32>}, {transform_indices = @transform_6, window_bounds = array<i64: 1, 256, 32>}]} {
    %c0 = arith.constant 0 : index
    %c0_0 = arith.constant 0 : index
    %c0_1 = arith.constant 0 : index
    %0 = vector.load %arg2[%c0, %c0_0, %c0_1] : memref<1x256x32xf32, #tpu.memory_space<vmem>>, vector<1x256x32xf32>
    %1 = vector.shape_cast %0 : vector<1x256x32xf32> to vector<256x32xf32>
    %2 = arith.truncf %1 : vector<256x32xf32> to vector<256x32xbf16>
    %c0_2 = arith.constant 0 : index
    %c0_3 = arith.constant 0 : index
    %3 = vector.load %arg3[%c0_2, %c0_3] : memref<32x32xbf16, #tpu.memory_space<vmem>>, vector<32x32xbf16>
    %cst = arith.constant dense<0.000000e+00> : vector<256x32xf32>
    %4 = tpu.matmul %2, %3, %cst {dimension_numbers = #tpu.dot_dimension_numbers<[1], [0], [0], [1], [0, 0, 1, 1], [], []>} : vector<256x32xbf16>, vector<32x32xbf16>, vector<256x32xf32> -> vector<256x32xf32>
    %c0_4 = arith.constant 0 : index
    %c0_5 = arith.constant 0 : index
    %5 = vector.load %arg5[%c0_4, %c0_5] : memref<1x32xf32, #tpu.memory_space<vmem>>, vector<1x32xf32>
    %6 = vector.broadcast %5 : vector<1x32xf32> to vector<256x32xf32>
    %7 = arith.addf %4, %6 : vector<256x32xf32>
    %c0_6 = arith.constant 0 : index
    %c0_7 = arith.constant 0 : index
    %8 = vector.load %arg4[%c0_6, %c0_7] : memref<32x32xbf16, #tpu.memory_space<vmem>>, vector<32x32xbf16>
    %cst_8 = arith.constant dense<0.000000e+00> : vector<256x32xf32>
    %9 = tpu.matmul %2, %8, %cst_8 {dimension_numbers = #tpu.dot_dimension_numbers<[1], [0], [0], [1], [0, 0, 1, 1], [], []>} : vector<256x32xbf16>, vector<32x32xbf16>, vector<256x32xf32> -> vector<256x32xf32>
    %c0_9 = arith.constant 0 : index
    %c0_10 = arith.constant 0 : index
    %10 = vector.load %arg6[%c0_9, %c0_10] : memref<1x32xf32, #tpu.memory_space<vmem>>, vector<1x32xf32>
    %11 = vector.broadcast %10 : vector<1x32xf32> to vector<256x32xf32>
    %12 = arith.addf %9, %11 : vector<256x32xf32>
    %13 = arith.truncf %7 : vector<256x32xf32> to vector<256x32xbf16>
    %c0_11 = arith.constant 0 : index
    %c0_12 = arith.constant 0 : index
    %c0_13 = arith.constant 0 : index
    %14 = vector.load %arg7[%c0_11, %c0_12, %c0_13] : memref<1x256x32xbf16, #tpu.memory_space<vmem>>, vector<1x256x32xbf16>
    %15 = vector.shape_cast %14 : vector<1x256x32xbf16> to vector<256x32xbf16>
    %16 = vector.shape_cast %13 : vector<256x32xbf16> to vector<1x256x32xbf16>
    tpu.vector_store %arg7[%c0_11, %c0_12, %c0_13], %16 {strides = array<i32>} : memref<1x256x32xbf16, #tpu.memory_space<vmem>>, vector<1x256x32xbf16>,
    %17 = arith.truncf %12 : vector<256x32xf32> to vector<256x32xbf16>
    %c0_14 = arith.constant 0 : index
    %c0_15 = arith.constant 0 : index
    %c0_16 = arith.constant 0 : index
    %18 = vector.load %arg8[%c0_14, %c0_15, %c0_16] : memref<1x256x32xbf16, #tpu.memory_space<vmem>>, vector<1x256x32xbf16>
    %19 = vector.shape_cast %18 : vector<1x256x32xbf16> to vector<256x32xbf16>
    %20 = vector.shape_cast %17 : vector<256x32xbf16> to vector<1x256x32xbf16>
    tpu.vector_store %arg8[%c0_14, %c0_15, %c0_16], %20 {strides = array<i32>} : memref<1x256x32xbf16, #tpu.memory_space<vmem>>, vector<1x256x32xbf16>,
    return
  }
  func.func @transform_0(%arg0: i32, %arg1: i32) -> (i32, i32, i32) {
    %c0_i32 = arith.constant 0 : i32
    %c0_i32_0 = arith.constant 0 : i32
    return %arg0, %arg1, %c0_i32 : i32, i32, i32
  }
  func.func @transform_1(%arg0: i32, %arg1: i32) -> (i32, i32) {
    %c0_i32 = arith.constant 0 : i32
    %c0_i32_0 = arith.constant 0 : i32
    %c0_i32_1 = arith.constant 0 : i32
    return %c0_i32, %c0_i32_0 : i32, i32
  }
  func.func @transform_2(%arg0: i32, %arg1: i32) -> (i32, i32) {
    %c0_i32 = arith.constant 0 : i32
    %c0_i32_0 = arith.constant 0 : i32
    %c0_i32_1 = arith.constant 0 : i32
    return %c0_i32, %c0_i32_0 : i32, i32
  }
  func.func @transform_3(%arg0: i32, %arg1: i32) -> (i32, i32) {
    %c0_i32 = arith.constant 0 : i32
    %c0_i32_0 = arith.constant 0 : i32
    %c0_i32_1 = arith.constant 0 : i32
    return %c0_i32, %c0_i32_0 : i32, i32
  }
  func.func @transform_4(%arg0: i32, %arg1: i32) -> (i32, i32) {
    %c0_i32 = arith.constant 0 : i32
    %c0_i32_0 = arith.constant 0 : i32
    %c0_i32_1 = arith.constant 0 : i32
    return %c0_i32, %c0_i32_0 : i32, i32
  }
  func.func @transform_5(%arg0: i32, %arg1: i32) -> (i32, i32, i32) {
    %c0_i32 = arith.constant 0 : i32
    %c0_i32_0 = arith.constant 0 : i32
    return %arg0, %arg1, %c0_i32 : i32, i32, i32
  }
  func.func @transform_6(%arg0: i32, %arg1: i32) -> (i32, i32, i32) {
    %c0_i32 = arith.constant 0 : i32
    %c0_i32_0 = arith.constant 0 : i32
    return %arg0, %arg1, %c0_i32 : i32, i32, i32
  }
}

</mosaic_0001>

<bundles_post_ra>
// kernel: tpu_custom_call.1
= control target key start
LH: loop header
LB: loop body
LE: loop exit
PB: predicated region body
PF: predicated region fallthrough
CT: control target
= control target key end

     0   :  { %6 = vsyncpa [#allocation3], 0  ;;  %s102_s0 = inlined_call_operand.hbm [shape: f32[8,128], index: 0, kind: input, shape index: {}]   ;;  %s103_s1 = inlined_call_operand.hbm [shape: f32[8,128], index: 1, kind: output, shape index: {}]  }
   0x1   :  { %7 = vsyncpa [#allocation4], 0  ;;  %s84_s6 = smov [#allocation2]  }
   0x2   :  { %s14_s7 = sshll.u32 %s84_s6, 4  ;;  %s15_s7 = int_to_ptr.vmem [resolvable:$true] %s14_s7 }
   0x3   :  { %s48_s8 = scalar_lea.vmem %s15_s7, 128  ;;  %p53_p1 = scmp.lt.s32.totalorder %s15_s7, %s15_s7 }
   0x4   :  { %p49_p0 = scmp.ne.s32.totalorder %s15_s7, %s48_s8  ;;  %p54_p2 = scmp.lt.s32.totalorder %s48_s8, %s48_s8 }
   0x6   :  { %p55_p3 = por %p54_p2, %p53_p1 }
   0x8   :  { %p56_p4 = pnand %p55_p3, %p49_p0 }
   0xa   :  { %59 = shalt.err (!%p56_p4)
}
   0xb   :  { %17 = dma.hbm_to_vmem [thread:$0]  %s102_s0, 128, %s15_s7, [#allocation3]  }
   0xc   :  { %80 = dma.done.wait [#allocation3], 128  }
   0xd   :  { %81 = vsyncadd [#allocation3], 4294967168  ;;  %s85_s11 = smov [#allocation5]   ;;  %v21_v0 = vld [vmem:[#allocation2] sm:$0xff] }
   0xe   :  { %s29_s12 = sshll.u32 %s85_s11, 4  ;;  %22 = vst [vmem:[#allocation5] sm:$0xff] %v21_v0  ;;  %s30_s12 = int_to_ptr.vmem [resolvable:$true] %s29_s12 }
   0xf   :  { %s60_s13 = scalar_lea.vmem %s30_s12, 128  ;;  %p65_p6 = scmp.lt.s32.totalorder %s30_s12, %s30_s12 }
  0x10   :  { %p61_p5 = scmp.ne.s32.totalorder %s30_s12, %s60_s13  ;;  %p66_p7 = scmp.lt.s32.totalorder %s60_s13, %s60_s13 }
  0x12   :  { %p67_p8 = por %p66_p7, %p65_p6 }
  0x14   :  { %p68_p9 = pnand %p67_p8, %p61_p5 }
  0x16   :  { %71 = shalt.err (!%p68_p9)
}
  0x17   :  { %32 = dma.vmem_to_hbm [thread:$0]  %s30_s12, 128, %s103_s1, [#allocation4]  }
  0x18   :  { %82 = dma.done.wait [#allocation4], 128  }
  0x19   :  { %83 = vsyncadd [#allocation4], 4294967168 }
  0x1a   :  { %36 = vsyncpa [#allocation3], 1 }
  0x1b   :  { %37 = vsyncpa [#allocation4], 1 }

// kernel: tpu_custom_call.1
= control target key start
LH: loop header
LB: loop body
LE: loop exit
PB: predicated region body
PF: predicated region fallthrough
CT: control target
= control target key end

     0   :  { %s1616_s21 = smov 0   ;;  %s1618_s22 = smov 0   ;;  %s1940_s0 = inlined_call_operand.vmem [shape: f32[2,256,32], index: 0, kind: input, shape index: {}]   ;;  %s1941_s1 = inlined_call_operand.vmem [shape: bf16[32,32], index: 1, kind: input, shape index: {}]   ;;  %s1942_s2 = inlined_call_operand.vmem [shape: bf16[32,32], index: 2, kind: input, shape index: {}]   ;;  %s1943_s3 = inlined_call_operand.vmem [shape: f32[1,32], index: 3, kind: input, shape index: {}]   ;;  %s1944_s4 = inlined_call_operand.vmem [shape: f32[1,32], index: 4, kind: input, shape index: {}]   ;;  %s1945_s5 = inlined_call_operand.vmem [shape: bf16[2,256,32], index: 5, kind: output, shape index: {0}]   ;;  %s1946_s6 = inlined_call_operand.vmem [shape: bf16[2,256,32], index: 6, kind: output, shape index: {1}]  }
   0x1   :  { %s1620_s23 = smov 0  }
   0x2 LB: > { %s29_s24 = sadd.s32 1, %s1575_s22  ;;  %p1243_p0 = scmp.ge.s32.totalorder %s1579_s23, 1  ;;  %s1579_s23 = sphi %s1620_s23, %s17_s23   ;;  %s1575_s22 = sphi %s1618_s22, %s1948_s22   ;;  %s1571_s21 = sphi %s1616_s21, %s1947_s21  }
   0x3   : > { %p31_p1 = scmp.ge.s32.totalorder %s29_s24, 2  ;;  %p238_p2 = scmp.lt.s32.totalorder %s1579_s23, 3 }
   0x5   : > { %s1950_s24 = smov (%p31_p1, %s29_s24), 0  ;;  %p239_p3 = pnand %p1243_p0, %p238_p2 }
   0x6   : > { %p286_p4 = scmp.lt.s32.totalorder (!%p239_p3), %s1571_s21, 1 }
   0x7   : > { %242 = sbr.rel (%p239_p3) target bundleno = 282 (0x11a), region = 40 }
   0xc   : > { %v1553_v0 = vld [vmem:[%s1941_s1 + $0x8] sm:$0xff]   ;;  %v1555_v2 = vld [vmem:[%s1941_s1] sm:$0xff]   ;;  %s1952_s21 = smov (!%p286_p4, %s1571_s21), 1  ;;  %vm387_vm0 = vcmask 261120   ;;  %vm909_vm1 = vcmask 257024  }
   0xd   : > { %v1554_v1 = vld [vmem:[%s1942_s2 + $0x8] sm:$0xff]   ;;  %1457 = vmatprep.subr.bf16.mxu0 %v1553_v0  ;;  %v1556_v3 = vld [vmem:[%s1942_s2] sm:$0xff]   ;;  %s1354_s9 = sshll.u32 %s1952_s21, 8  ;;  %s1355_s15 = sshll.u32 %s1952_s21, 7 }
   0xe   : > { %1493 = vmatprep.subr.bf16.mxu1 %v1554_v1  ;;  %1458 = vmatpush3.bf16.msra.mxu0 %v1553_v0  ;;  %s1652_s12 = scalar_lea.vmem %s1940_s0, %s1354_s9  ;;  %v1721_v52 = vld [vmem:[%s1943_s3] ss:$0 sm:$0xff]  ;;  %s1733_s20 = scalar_lea.vmem %s1945_s5, %s1355_s15 }
   0xf   : > { %1494 = vmatpush3.bf16.msra.mxu1 %v1554_v1  ;;  %1459 = vmatprep.subr.bf16.mxu0 %v1555_v2  ;;  %v316_v4 = vld [vmem:[%s1652_s12] sm:$0xff]  ;;  %v317_v5 = vld [vmem:[%s1652_s12 + $0x8] sm:$0xff]  ;;  %v318_v6 = vld [vmem:[%s1652_s12 + $0x10] sm:$0xff]  ;;  %s1739_s26 = scalar_lea.vmem %s1946_s6, %s1355_s15 }
  0x10   : > { %1495 = vmatprep.subr.bf16.mxu1 %v1556_v3  ;;  %v348_v7 = vpack.c.bf16 %v317_v5, %v316_v4  ;;  %v319_v8 = vld [vmem:[%s1652_s12 + $0x18] sm:$0xff]  ;;  %v320_v9 = vld [vmem:[%s1652_s12 + $0x20] sm:$0xff]  ;;  %v321_v10 = vld [vmem:[%s1652_s12 + $0x28] sm:$0xff] }
  0x11   : > { %v349_v11 = vpack.c.bf16 %v319_v8, %v318_v6  ;;  %v350_v12 = vpack.c.bf16 %v321_v10, %v320_v9  ;;  %v322_v13 = vld [vmem:[%s1652_s12 + $0x30] sm:$0xff]  ;;  %v323_v14 = vld [vmem:[%s1652_s12 + $0x38] sm:$0xff]  ;;  %v324_v15 = vld [vmem:[%s1652_s12 + $0x40] sm:$0xff] }
  0x12   : > { %1460 = vmatpush3.bf16.msra.mxu0 %v1555_v2  ;;  %1461 = vmatprep.mubr.msk.bf16.mxu0 %vm387_vm0, %v348_v7  ;;  %v325_v16 = vld [vmem:[%s1652_s12 + $0x48] sm:$0xff]  ;;  %v351_v17 = vpack.c.bf16 %v323_v14, %v322_v13  ;;  %v326_v19 = vld [vmem:[%s1652_s12 + $0x50] sm:$0xff]  ;;  %v327_v20 = vld [vmem:[%s1652_s12 + $0x58] sm:$0xff] }
  0x13   : > { %1496 = vmatpush3.bf16.msra.mxu1 %v1556_v3  ;;  %1497 = vmatprep.mubr.msk.bf16.mxu1 %vm387_vm0, %v348_v7  ;;  %v352_v18 = vpack.c.bf16 %v325_v16, %v324_v15  ;;  %v328_v21 = vld [vmem:[%s1652_s12 + $0x60] sm:$0xff]  ;;  %v329_v22 = vld [vmem:[%s1652_s12 + $0x68] sm:$0xff]  ;;  %v353_v23 = vpack.c.bf16 %v327_v20, %v326_v19  ;;  %v330_v25 = vld [vmem:[%s1652_s12 + $0x70] sm:$0xff] }
  0x14   : > { %v354_v24 = vpack.c.bf16 %v329_v22, %v328_v21  ;;  %v331_v26 = vld [vmem:[%s1652_s12 + $0x78] sm:$0xff]  ;;  %v332_v27 = vld [vmem:[%s1652_s12 + $0x80] sm:$0xff]  ;;  %v333_v28 = vld [vmem:[%s1652_s12 + $0x88] sm:$0xff] }
  0x15   : > { %1462 = vmatmul.mubr.msk.bf16.vlgmr.msra.gmra.mxu0 %vm387_vm0, %v349_v11  ;;  %v355_v29 = vpack.c.bf16 %v331_v26, %v330_v25  ;;  %v356_v30 = vpack.c.bf16 %v333_v28, %v332_v27  ;;  %v334_v31 = vld [vmem:[%s1652_s12 + $0x90] sm:$0xff]  ;;  %v335_v32 = vld [vmem:[%s1652_s12 + $0x98] sm:$0xff]  ;;  %v336_v33 = vld [vmem:[%s1652_s12 + $0xa0] sm:$0xff] }
  0x16   : > { %1498 = vmatmul.mubr.msk.bf16.vlgmr.msra.gmra.mxu1 %vm387_vm0, %v349_v11  ;;  %1465 = vmatprep.mubr.msk.bf16.mxu0 %vm387_vm0, %v350_v12  ;;  %v337_v34 = vld [vmem:[%s1652_s12 + $0xa8] sm:$0xff]  ;;  %v357_v35 = vpack.c.bf16 %v335_v32, %v334_v31  ;;  %v338_v37 = vld [vmem:[%s1652_s12 + $0xb0] sm:$0xff]  ;;  %v339_v38 = vld [vmem:[%s1652_s12 + $0xb8] sm:$0xff] }
  0x17   : > { %1501 = vmatprep.mubr.msk.bf16.mxu1 %vm387_vm0, %v350_v12  ;;  %v358_v36 = vpack.c.bf16 %v337_v34, %v336_v33  ;;  %v340_v39 = vld [vmem:[%s1652_s12 + $0xc0] sm:$0xff]  ;;  %v341_v40 = vld [vmem:[%s1652_s12 + $0xc8] sm:$0xff]  ;;  %v359_v41 = vpack.c.bf16 %v339_v38, %v338_v37  ;;  %v342_v43 = vld [vmem:[%s1652_s12 + $0xd0] sm:$0xff] }
  0x18   : > { %v360_v42 = vpack.c.bf16 %v341_v40, %v340_v39  ;;  %v343_v44 = vld [vmem:[%s1652_s12 + $0xd8] sm:$0xff]  ;;  %v344_v45 = vld [vmem:[%s1652_s12 + $0xe0] sm:$0xff]  ;;  %v345_v46 = vld [vmem:[%s1652_s12 + $0xe8] sm:$0xff] }
  0x19   : > { %v361_v47 = vpack.c.bf16 %v343_v44, %v342_v43  ;;  %v362_v48 = vpack.c.bf16 %v345_v46, %v344_v45  ;;  %v346_v49 = vld [vmem:[%s1652_s12 + $0xf0] sm:$0xff]  ;;  %v347_v50 = vld [vmem:[%s1652_s12 + $0xf8] sm:$0xff]  ;;  %v1727_v53 = vld [vmem:[%s1944_s4] ss:$0 sm:$0xff] }
  0x1a   : > { %v363_v51 = vpack.c.bf16 %v347_v50, %v346_v49 }
  0x1d   : > { %1466 = vmatmul.mubr.msk.bf16.gmra.mxu0 %vm387_vm0, %v351_v17 }
  0x1e   : > { %1502 = vmatmul.mubr.msk.bf16.gmra.mxu1 %vm387_vm0, %v351_v17  ;;  %1469 = vmatprep.mubr.msk.bf16.mxu0 %vm387_vm0, %v352_v18 }
  0x1f   : > { %1505 = vmatprep.mubr.msk.bf16.mxu1 %vm387_vm0, %v352_v18 }
  0x25   : > { %1470 = vmatmul.mubr.msk.bf16.gmra.mxu0 %vm387_vm0, %v353_v23 }
  0x26   : > { %1506 = vmatmul.mubr.msk.bf16.gmra.mxu1 %vm387_vm0, %v353_v23  ;;  %1473 = vmatprep.mubr.msk.bf16.mxu0 %vm387_vm0, %v354_v24 }
  0x27   : > { %1509 = vmatprep.mubr.msk.bf16.mxu1 %vm387_vm0, %v354_v24 }
  0x2d   : > { %1474 = vmatmul.mubr.msk.bf16.gmra.mxu0 %vm387_vm0, %v355_v29 }
  0x2e   : > { %1510 = vmatmul.mubr.msk.bf16.gmra.mxu1 %vm387_vm0, %v355_v29  ;;  %1477 = vmatprep.mubr.msk.bf16.mxu0 %vm387_vm0, %v356_v30 }
  0x2f   : > { %1513 = vmatprep.mubr.msk.bf16.mxu1 %vm387_vm0, %v356_v30 }
  0x35   : > { %1478 = vmatmul.mubr.msk.bf16.gmra.mxu0 %vm387_vm0, %v357_v35 }
  0x36   : > { %1514 = vmatmul.mubr.msk.bf16.gmra.mxu1 %vm387_vm0, %v357_v35  ;;  %1481 = vmatprep.mubr.msk.bf16.mxu0 %vm387_vm0, %v358_v36 }
  0x37   : > { %1517 = vmatprep.mubr.msk.bf16.mxu1 %vm387_vm0, %v358_v36 }
  0x3d   : > { %1482 = vmatmul.mubr.msk.bf16.gmra.mxu0 %vm387_vm0, %v359_v41 }
  0x3e   : > { %1518 = vmatmul.mubr.msk.bf16.gmra.mxu1 %vm387_vm0, %v359_v41  ;;  %1485 = vmatprep.mubr.msk.bf16.mxu0 %vm387_vm0, %v360_v42 }
  0x3f   : > { %1521 = vmatprep.mubr.msk.bf16.mxu1 %vm387_vm0, %v360_v42 }
  0x45   : > { %1486 = vmatmul.mubr.msk.bf16.gmra.mxu0 %vm387_vm0, %v361_v47 }
  0x46   : > { %1522 = vmatmul.mubr.msk.bf16.gmra.mxu1 %vm387_vm0, %v361_v47  ;;  %1489 = vmatprep.mubr.msk.bf16.mxu0 %vm387_vm0, %v362_v48 }
  0x47   : > { %1525 = vmatprep.mubr.msk.bf16.mxu1 %vm387_vm0, %v362_v48 }
  0x4d   : > { %1490 = vmatmul.mubr.msk.bf16.gmra.mxu0 %vm387_vm0, %v363_v51 }
  0x4e   : > { %1526 = vmatmul.mubr.msk.bf16.gmra.mxu1 %vm387_vm0, %v363_v51 }
  0xd5   : > { %v1463_v54 = vpop.f32.mrf.mxu0 }
  0xd6   : > { %v479_v55 = vadd.f32 %v1463_v54, %v1721_v52  ;;  %v1499_v56 = vpop.f32.mrf.mxu1 }
  0xd7   : > { %v663_v57 = vadd.f32 %v1499_v56, %v1727_v53  ;;  %v470_v58 = vpop.f32.mrf.mxu0 }
  0xd8   : > { %v1359_v59 = vpack.c.bf16 %v479_v55, %v479_v55  ;;  %v471_v60 = vadd.f32 %v1721_v52, %v470_v58  ;;  %v654_v61 = vpop.f32.mrf.mxu1 }
  0xd9   : > { %v1391_v62 = vpack.c.bf16 %v663_v57, %v663_v57  ;;  %v655_v63 = vadd.f32 %v1727_v53, %v654_v61  ;;  %v1464_v0 = vpop.f32.mrf.mxu0 }
  0xda   : > { %912 = vst.msk [vmem:[%s1733_s20 + $0x8] sm:$0xf] %vm909_vm1, %v1359_v59  ;;  %v1357_v1 = vpack.c.bf16 %v471_v60, %v471_v60  ;;  %v482_v2 = vadd.f32 %v1464_v0, %v1721_v52  ;;  %v1500_v3 = vpop.f32.mrf.mxu1 }
  0xdb   : > { %1072 = vst.msk [vmem:[%s1739_s26 + $0x8] sm:$0xf] %vm909_vm1, %v1391_v62  ;;  %v1389_v4 = vpack.c.bf16 %v655_v63, %v655_v63  ;;  %v666_v5 = vadd.f32 %v1500_v3, %v1727_v53  ;;  %v473_v6 = vpop.f32.mrf.mxu0 }
  0xdc   : > { %910 = vst.msk [vmem:[%s1733_s20] sm:$0xf] %vm909_vm1, %v1357_v1  ;;  %v1360_v7 = vpack.c.bf16 %v482_v2, %v482_v2  ;;  %v474_v8 = vadd.f32 %v1721_v52, %v473_v6  ;;  %v657_v9 = vpop.f32.mrf.mxu1 }
  0xdd   : > { %1070 = vst.msk [vmem:[%s1739_s26] sm:$0xf] %vm909_vm1, %v1389_v4  ;;  %v1392_v10 = vpack.c.bf16 %v666_v5, %v666_v5  ;;  %v658_v11 = vadd.f32 %v1727_v53, %v657_v9  ;;  %v1467_v12 = vpop.f32.mrf.mxu0 }
  0xde   : > { %913 = vst.msk [vmem:[%s1733_s20 + $0xc] sm:$0xf] %vm909_vm1, %v1360_v7  ;;  %v1358_v13 = vpack.c.bf16 %v474_v8, %v474_v8  ;;  %v495_v14 = vadd.f32 %v1467_v12, %v1721_v52  ;;  %v1503_v15 = vpop.f32.mrf.mxu1 }
  0xdf   : > { %1073 = vst.msk [vmem:[%s1739_s26 + $0xc] sm:$0xf] %vm909_vm1, %v1392_v10  ;;  %v1390_v16 = vpack.c.bf16 %v658_v11, %v658_v11  ;;  %v679_v17 = vadd.f32 %v1503_v15, %v1727_v53  ;;  %v486_v18 = vpop.f32.mrf.mxu0 }
  0xe0   : > { %911 = vst.msk [vmem:[%s1733_s20 + $0x4] sm:$0xf] %vm909_vm1, %v1358_v13  ;;  %v1363_v19 = vpack.c.bf16 %v495_v14, %v495_v14  ;;  %v487_v20 = vadd.f32 %v1721_v52, %v486_v18  ;;  %v670_v21 = vpop.f32.mrf.mxu1 }
  0xe1   : > { %1071 = vst.msk [vmem:[%s1739_s26 + $0x4] sm:$0xf] %vm909_vm1, %v1390_v16  ;;  %v1395_v22 = vpack.c.bf16 %v679_v17, %v679_v17  ;;  %v671_v23 = vadd.f32 %v1727_v53, %v670_v21  ;;  %v1468_v24 = vpop.f32.mrf.mxu0 }
  0xe2   : > { %916 = vst.msk [vmem:[%s1733_s20 + $0x18] sm:$0xf] %vm909_vm1, %v1363_v19  ;;  %v1361_v25 = vpack.c.bf16 %v487_v20, %v487_v20  ;;  %v498_v26 = vadd.f32 %v1468_v24, %v1721_v52  ;;  %v1504_v27 = vpop.f32.mrf.mxu1 }
  0xe3   : > { %1076 = vst.msk [vmem:[%s1739_s26 + $0x18] sm:$0xf] %vm909_vm1, %v1395_v22  ;;  %v1393_v28 = vpack.c.bf16 %v671_v23, %v671_v23  ;;  %v682_v29 = vadd.f32 %v1504_v27, %v1727_v53  ;;  %v489_v30 = vpop.f32.mrf.mxu0 }
  0xe4   : > { %914 = vst.msk [vmem:[%s1733_s20 + $0x10] sm:$0xf] %vm909_vm1, %v1361_v25  ;;  %v1364_v31 = vpack.c.bf16 %v498_v26, %v498_v26  ;;  %v490_v32 = vadd.f32 %v1721_v52, %v489_v30  ;;  %v673_v33 = vpop.f32.mrf.mxu1 }
  0xe5   : > { %1074 = vst.msk [vmem:[%s1739_s26 + $0x10] sm:$0xf] %vm909_vm1, %v1393_v28  ;;  %v1396_v34 = vpack.c.bf16 %v682_v29, %v682_v29  ;;  %v674_v35 = vadd.f32 %v1727_v53, %v673_v33  ;;  %v1471_v36 = vpop.f32.mrf.mxu0 }
  0xe6   : > { %917 = vst.msk [vmem:[%s1733_s20 + $0x1c] sm:$0xf] %vm909_vm1, %v1364_v31  ;;  %v1362_v37 = vpack.c.bf16 %v490_v32, %v490_v32  ;;  %v511_v38 = vadd.f32 %v1471_v36, %v1721_v52  ;;  %v1507_v39 = vpop.f32.mrf.mxu1 }
  0xe7   : > { %1077 = vst.msk [vmem:[%s1739_s26 + $0x1c] sm:$0xf] %vm909_vm1, %v1396_v34  ;;  %v1394_v40 = vpack.c.bf16 %v674_v35, %v674_v35  ;;  %v695_v41 = vadd.f32 %v1507_v39, %v1727_v53  ;;  %v502_v42 = vpop.f32.mrf.mxu0 }
  0xe8   : > { %915 = vst.msk [vmem:[%s1733_s20 + $0x14] sm:$0xf] %vm909_vm1, %v1362_v37  ;;  %v1367_v43 = vpack.c.bf16 %v511_v38, %v511_v38  ;;  %v503_v44 = vadd.f32 %v1721_v52, %v502_v42  ;;  %v686_v45 = vpop.f32.mrf.mxu1 }
  0xe9   : > { %1075 = vst.msk [vmem:[%s1739_s26 + $0x14] sm:$0xf] %vm909_vm1, %v1394_v40  ;;  %v1399_v46 = vpack.c.bf16 %v695_v41, %v695_v41  ;;  %v687_v47 = vadd.f32 %v1727_v53, %v686_v45  ;;  %v1472_v48 = vpop.f32.mrf.mxu0 }
  0xea   : > { %920 = vst.msk [vmem:[%s1733_s20 + $0x28] sm:$0xf] %vm909_vm1, %v1367_v43  ;;  %v1365_v49 = vpack.c.bf16 %v503_v44, %v503_v44  ;;  %v514_v50 = vadd.f32 %v1472_v48, %v1721_v52  ;;  %v1508_v51 = vpop.f32.mrf.mxu1 }
  0xeb   : > { %1080 = vst.msk [vmem:[%s1739_s26 + $0x28] sm:$0xf] %vm909_vm1, %v1399_v46  ;;  %v1397_v54 = vpack.c.bf16 %v687_v47, %v687_v47  ;;  %v698_v55 = vadd.f32 %v1508_v51, %v1727_v53  ;;  %v505_v56 = vpop.f32.mrf.mxu0 }
  0xec   : > { %918 = vst.msk [vmem:[%s1733_s20 + $0x20] sm:$0xf] %vm909_vm1, %v1365_v49  ;;  %v1368_v57 = vpack.c.bf16 %v514_v50, %v514_v50  ;;  %v506_v58 = vadd.f32 %v1721_v52, %v505_v56  ;;  %v689_v59 = vpop.f32.mrf.mxu1 }
  0xed   : > { %1078 = vst.msk [vmem:[%s1739_s26 + $0x20] sm:$0xf] %vm909_vm1, %v1397_v54  ;;  %v1400_v60 = vpack.c.bf16 %v698_v55, %v698_v55  ;;  %v690_v61 = vadd.f32 %v1727_v53, %v689_v59  ;;  %v1475_v62 = vpop.f32.mrf.mxu0 }
  0xee   : > { %921 = vst.msk [vmem:[%s1733_s20 + $0x2c] sm:$0xf] %vm909_vm1, %v1368_v57  ;;  %v1366_v63 = vpack.c.bf16 %v506_v58, %v506_v58  ;;  %v527_v0 = vadd.f32 %v1475_v62, %v1721_v52  ;;  %v1511_v1 = vpop.f32.mrf.mxu1 }
  0xef   : > { %1081 = vst.msk [vmem:[%s1739_s26 + $0x2c] sm:$0xf] %vm909_vm1, %v1400_v60  ;;  %v1398_v2 = vpack.c.bf16 %v690_v61, %v690_v61  ;;  %v711_v3 = vadd.f32 %v1511_v1, %v1727_v53  ;;  %v518_v4 = vpop.f32.mrf.mxu0 }
  0xf0   : > { %919 = vst.msk [vmem:[%s1733_s20 + $0x24] sm:$0xf] %vm909_vm1, %v1366_v63  ;;  %v1371_v5 = vpack.c.bf16 %v527_v0, %v527_v0  ;;  %v519_v6 = vadd.f32 %v1721_v52, %v518_v4  ;;  %v702_v7 = vpop.f32.mrf.mxu1 }
  0xf1   : > { %1079 = vst.msk [vmem:[%s1739_s26 + $0x24] sm:$0xf] %vm909_vm1, %v1398_v2  ;;  %v1403_v8 = vpack.c.bf16 %v711_v3, %v711_v3  ;;  %v703_v9 = vadd.f32 %v1727_v53, %v702_v7  ;;  %v1476_v10 = vpop.f32.mrf.mxu0 }
  0xf2   : > { %924 = vst.msk [vmem:[%s1733_s20 + $0x38] sm:$0xf] %vm909_vm1, %v1371_v5  ;;  %v1369_v11 = vpack.c.bf16 %v519_v6, %v519_v6  ;;  %v530_v12 = vadd.f32 %v1476_v10, %v1721_v52  ;;  %v1512_v13 = vpop.f32.mrf.mxu1 }
  0xf3   : > { %1084 = vst.msk [vmem:[%s1739_s26 + $0x38] sm:$0xf] %vm909_vm1, %v1403_v8  ;;  %v1401_v14 = vpack.c.bf16 %v703_v9, %v703_v9  ;;  %v714_v15 = vadd.f32 %v1512_v13, %v1727_v53  ;;  %v521_v16 = vpop.f32.mrf.mxu0 }
  0xf4   : > { %922 = vst.msk [vmem:[%s1733_s20 + $0x30] sm:$0xf] %vm909_vm1, %v1369_v11  ;;  %v1372_v17 = vpack.c.bf16 %v530_v12, %v530_v12  ;;  %v522_v18 = vadd.f32 %v1721_v52, %v521_v16  ;;  %v705_v19 = vpop.f32.mrf.mxu1 }
  0xf5   : > { %1082 = vst.msk [vmem:[%s1739_s26 + $0x30] sm:$0xf] %vm909_vm1, %v1401_v14  ;;  %v1404_v20 = vpack.c.bf16 %v714_v15, %v714_v15  ;;  %v706_v21 = vadd.f32 %v1727_v53, %v705_v19  ;;  %v1479_v22 = vpop.f32.mrf.mxu0 }
  0xf6   : > { %925 = vst.msk [vmem:[%s1733_s20 + $0x3c] sm:$0xf] %vm909_vm1, %v1372_v17  ;;  %v1370_v23 = vpack.c.bf16 %v522_v18, %v522_v18  ;;  %v543_v24 = vadd.f32 %v1479_v22, %v1721_v52  ;;  %v1515_v25 = vpop.f32.mrf.mxu1 }
  0xf7   : > { %1085 = vst.msk [vmem:[%s1739_s26 + $0x3c] sm:$0xf] %vm909_vm1, %v1404_v20  ;;  %v1402_v26 = vpack.c.bf16 %v706_v21, %v706_v21  ;;  %v727_v27 = vadd.f32 %v1515_v25, %v1727_v53  ;;  %v534_v28 = vpop.f32.mrf.mxu0 }
  0xf8   : > { %923 = vst.msk [vmem:[%s1733_s20 + $0x34] sm:$0xf] %vm909_vm1, %v1370_v23  ;;  %v1375_v29 = vpack.c.bf16 %v543_v24, %v543_v24  ;;  %v535_v30 = vadd.f32 %v1721_v52, %v534_v28  ;;  %v718_v31 = vpop.f32.mrf.mxu1 }
  0xf9   : > { %1083 = vst.msk [vmem:[%s1739_s26 + $0x34] sm:$0xf] %vm909_vm1, %v1402_v26  ;;  %v1407_v32 = vpack.c.bf16 %v727_v27, %v727_v27  ;;  %v719_v33 = vadd.f32 %v1727_v53, %v718_v31  ;;  %v1480_v34 = vpop.f32.mrf.mxu0 }
  0xfa   : > { %928 = vst.msk [vmem:[%s1733_s20 + $0x48] sm:$0xf] %vm909_vm1, %v1375_v29  ;;  %v1373_v35 = vpack.c.bf16 %v535_v30, %v535_v30  ;;  %v546_v36 = vadd.f32 %v1480_v34, %v1721_v52  ;;  %v1516_v37 = vpop.f32.mrf.mxu1 }
  0xfb   : > { %1088 = vst.msk [vmem:[%s1739_s26 + $0x48] sm:$0xf] %vm909_vm1, %v1407_v32  ;;  %v1405_v38 = vpack.c.bf16 %v719_v33, %v719_v33  ;;  %v730_v39 = vadd.f32 %v1516_v37, %v1727_v53  ;;  %v537_v40 = vpop.f32.mrf.mxu0 }
  0xfc   : > { %926 = vst.msk [vmem:[%s1733_s20 + $0x40] sm:$0xf] %vm909_vm1, %v1373_v35  ;;  %v1376_v41 = vpack.c.bf16 %v546_v36, %v546_v36  ;;  %v538_v42 = vadd.f32 %v1721_v52, %v537_v40  ;;  %v721_v43 = vpop.f32.mrf.mxu1 }
  0xfd   : > { %1086 = vst.msk [vmem:[%s1739_s26 + $0x40] sm:$0xf] %vm909_vm1, %v1405_v38  ;;  %v1408_v44 = vpack.c.bf16 %v730_v39, %v730_v39  ;;  %v722_v45 = vadd.f32 %v1727_v53, %v721_v43  ;;  %v1483_v46 = vpop.f32.mrf.mxu0 }
  0xfe   : > { %929 = vst.msk [vmem:[%s1733_s20 + $0x4c] sm:$0xf] %vm909_vm1, %v1376_v41  ;;  %v1374_v47 = vpack.c.bf16 %v538_v42, %v538_v42  ;;  %v559_v48 = vadd.f32 %v1483_v46, %v1721_v52  ;;  %v1519_v49 = vpop.f32.mrf.mxu1 }
  0xff   : > { %1089 = vst.msk [vmem:[%s1739_s26 + $0x4c] sm:$0xf] %vm909_vm1, %v1408_v44  ;;  %v1406_v50 = vpack.c.bf16 %v722_v45, %v722_v45  ;;  %v743_v51 = vadd.f32 %v1519_v49, %v1727_v53  ;;  %v550_v54 = vpop.f32.mrf.mxu0 }
 0x100   : > { %927 = vst.msk [vmem:[%s1733_s20 + $0x44] sm:$0xf] %vm909_vm1, %v1374_v47  ;;  %v1379_v55 = vpack.c.bf16 %v559_v48, %v559_v48  ;;  %v551_v56 = vadd.f32 %v1721_v52, %v550_v54  ;;  %v734_v57 = vpop.f32.mrf.mxu1 }
 0x101   : > { %1087 = vst.msk [vmem:[%s1739_s26 + $0x44] sm:$0xf] %vm909_vm1, %v1406_v50  ;;  %v1411_v58 = vpack.c.bf16 %v743_v51, %v743_v51  ;;  %v735_v59 = vadd.f32 %v1727_v53, %v734_v57  ;;  %v1484_v60 = vpop.f32.mrf.mxu0 }
 0x102   : > { %932 = vst.msk [vmem:[%s1733_s20 + $0x58] sm:$0xf] %vm909_vm1, %v1379_v55  ;;  %v1377_v61 = vpack.c.bf16 %v551_v56, %v551_v56  ;;  %v562_v62 = vadd.f32 %v1484_v60, %v1721_v52  ;;  %v1520_v63 = vpop.f32.mrf.mxu1 }
 0x103   : > { %1092 = vst.msk [vmem:[%s1739_s26 + $0x58] sm:$0xf] %vm909_vm1, %v1411_v58  ;;  %v1409_v0 = vpack.c.bf16 %v735_v59, %v735_v59  ;;  %v746_v1 = vadd.f32 %v1520_v63, %v1727_v53  ;;  %v553_v2 = vpop.f32.mrf.mxu0 }
 0x104   : > { %930 = vst.msk [vmem:[%s1733_s20 + $0x50] sm:$0xf] %vm909_vm1, %v1377_v61  ;;  %v1380_v3 = vpack.c.bf16 %v562_v62, %v562_v62  ;;  %v554_v4 = vadd.f32 %v1721_v52, %v553_v2  ;;  %v737_v5 = vpop.f32.mrf.mxu1 }
 0x105   : > { %1090 = vst.msk [vmem:[%s1739_s26 + $0x50] sm:$0xf] %vm909_vm1, %v1409_v0  ;;  %v1412_v6 = vpack.c.bf16 %v746_v1, %v746_v1  ;;  %v738_v7 = vadd.f32 %v1727_v53, %v737_v5  ;;  %v1487_v8 = vpop.f32.mrf.mxu0 }
 0x106   : > { %933 = vst.msk [vmem:[%s1733_s20 + $0x5c] sm:$0xf] %vm909_vm1, %v1380_v3  ;;  %v1378_v9 = vpack.c.bf16 %v554_v4, %v554_v4  ;;  %v575_v10 = vadd.f32 %v1487_v8, %v1721_v52  ;;  %v1523_v11 = vpop.f32.mrf.mxu1 }
 0x107   : > { %1093 = vst.msk [vmem:[%s1739_s26 + $0x5c] sm:$0xf] %vm909_vm1, %v1412_v6  ;;  %v1410_v12 = vpack.c.bf16 %v738_v7, %v738_v7  ;;  %v759_v13 = vadd.f32 %v1523_v11, %v1727_v53  ;;  %v566_v14 = vpop.f32.mrf.mxu0 }
 0x108   : > { %931 = vst.msk [vmem:[%s1733_s20 + $0x54] sm:$0xf] %vm909_vm1, %v1378_v9  ;;  %v1383_v15 = vpack.c.bf16 %v575_v10, %v575_v10  ;;  %v567_v16 = vadd.f32 %v1721_v52, %v566_v14  ;;  %v750_v17 = vpop.f32.mrf.mxu1 }
 0x109   : > { %1091 = vst.msk [vmem:[%s1739_s26 + $0x54] sm:$0xf] %vm909_vm1, %v1410_v12  ;;  %v1415_v18 = vpack.c.bf16 %v759_v13, %v759_v13  ;;  %v751_v19 = vadd.f32 %v1727_v53, %v750_v17  ;;  %v1488_v20 = vpop.f32.mrf.mxu0 }
 0x10a   : > { %936 = vst.msk [vmem:[%s1733_s20 + $0x68] sm:$0xf] %vm909_vm1, %v1383_v15  ;;  %v1381_v21 = vpack.c.bf16 %v567_v16, %v567_v16  ;;  %v578_v22 = vadd.f32 %v1488_v20, %v1721_v52  ;;  %v1524_v23 = vpop.f32.mrf.mxu1 }
 0x10b   : > { %1096 = vst.msk [vmem:[%s1739_s26 + $0x68] sm:$0xf] %vm909_vm1, %v1415_v18  ;;  %v1413_v24 = vpack.c.bf16 %v751_v19, %v751_v19  ;;  %v762_v25 = vadd.f32 %v1524_v23, %v1727_v53  ;;  %v569_v26 = vpop.f32.mrf.mxu0 }
 0x10c   : > { %934 = vst.msk [vmem:[%s1733_s20 + $0x60] sm:$0xf] %vm909_vm1, %v1381_v21  ;;  %v1384_v27 = vpack.c.bf16 %v578_v22, %v578_v22  ;;  %v570_v28 = vadd.f32 %v1721_v52, %v569_v26  ;;  %v753_v29 = vpop.f32.mrf.mxu1 }
 0x10d   : > { %1094 = vst.msk [vmem:[%s1739_s26 + $0x60] sm:$0xf] %vm909_vm1, %v1413_v24  ;;  %v1416_v30 = vpack.c.bf16 %v762_v25, %v762_v25  ;;  %v754_v31 = vadd.f32 %v1727_v53, %v753_v29  ;;  %v1491_v32 = vpop.f32.mrf.mxu0 }
 0x10e   : > { %937 = vst.msk [vmem:[%s1733_s20 + $0x6c] sm:$0xf] %vm909_vm1, %v1384_v27  ;;  %v1382_v33 = vpack.c.bf16 %v570_v28, %v570_v28  ;;  %v591_v34 = vadd.f32 %v1491_v32, %v1721_v52  ;;  %v1527_v35 = vpop.f32.mrf.mxu1 }
 0x10f   : > { %1097 = vst.msk [vmem:[%s1739_s26 + $0x6c] sm:$0xf] %vm909_vm1, %v1416_v30  ;;  %v1414_v36 = vpack.c.bf16 %v754_v31, %v754_v31  ;;  %v775_v37 = vadd.f32 %v1527_v35, %v1727_v53  ;;  %v582_v38 = vpop.f32.mrf.mxu0 }
 0x110   : > { %935 = vst.msk [vmem:[%s1733_s20 + $0x64] sm:$0xf] %vm909_vm1, %v1382_v33  ;;  %v1387_v39 = vpack.c.bf16 %v591_v34, %v591_v34  ;;  %v583_v40 = vadd.f32 %v1721_v52, %v582_v38  ;;  %v766_v41 = vpop.f32.mrf.mxu1 }
 0x111   : > { %1095 = vst.msk [vmem:[%s1739_s26 + $0x64] sm:$0xf] %vm909_vm1, %v1414_v36  ;;  %v1419_v42 = vpack.c.bf16 %v775_v37, %v775_v37  ;;  %v767_v43 = vadd.f32 %v1727_v53, %v766_v41  ;;  %v1492_v44 = vpop.f32.mrf.mxu0 }
 0x112   : > { %940 = vst.msk [vmem:[%s1733_s20 + $0x78] sm:$0xf] %vm909_vm1, %v1387_v39  ;;  %v1385_v45 = vpack.c.bf16 %v583_v40, %v583_v40  ;;  %v594_v46 = vadd.f32 %v1492_v44, %v1721_v52  ;;  %v1528_v47 = vpop.f32.mrf.mxu1 }
 0x113   : > { %1100 = vst.msk [vmem:[%s1739_s26 + $0x78] sm:$0xf] %vm909_vm1, %v1419_v42  ;;  %v1417_v48 = vpack.c.bf16 %v767_v43, %v767_v43  ;;  %v778_v49 = vadd.f32 %v1528_v47, %v1727_v53  ;;  %v585_v50 = vpop.f32.mrf.mxu0 }
 0x114   : > { %938 = vst.msk [vmem:[%s1733_s20 + $0x70] sm:$0xf] %vm909_vm1, %v1385_v45  ;;  %v1388_v51 = vpack.c.bf16 %v594_v46, %v594_v46  ;;  %v586_v54 = vadd.f32 %v1721_v52, %v585_v50  ;;  %v769_v55 = vpop.f32.mrf.mxu1 }
 0x115   : > { %1098 = vst.msk [vmem:[%s1739_s26 + $0x70] sm:$0xf] %vm909_vm1, %v1417_v48  ;;  %v1420_v56 = vpack.c.bf16 %v778_v49, %v778_v49  ;;  %v770_v57 = vadd.f32 %v1727_v53, %v769_v55 }
 0x116   : > { %941 = vst.msk [vmem:[%s1733_s20 + $0x7c] sm:$0xf] %vm909_vm1, %v1388_v51  ;;  %v1386_v58 = vpack.c.bf16 %v586_v54, %v586_v54 }
 0x117   : > { %1101 = vst.msk [vmem:[%s1739_s26 + $0x7c] sm:$0xf] %vm909_vm1, %v1420_v56  ;;  %v1418_v59 = vpack.c.bf16 %v770_v57, %v770_v57 }
 0x118   : > { %939 = vst.msk [vmem:[%s1733_s20 + $0x74] sm:$0xf] %vm909_vm1, %v1386_v58 }
 0x119   : > { %1099 = vst.msk [vmem:[%s1739_s26 + $0x74] sm:$0xf] %vm909_vm1, %v1418_v59 }
 0x11a PF: > { %s17_s23 = sadd.s32 1, %s1579_s23   ;;  %s1947_s21 = smov %s1575_s22 }
 0x11b   : > { %p14_p5 = scmp.ge.s32.totalorder %s17_s23, 4   ;;  %s1948_s22 = smov %s1950_s24 }
 0x11d   :  { %16 = sbr.rel (!%p14_p5) target bundleno = 2 (0x2), region = 82 }

</bundles_post_ra>
